<compile_context>
chip_gen: v7x
topology: tpu7x:2x2x1
jax: 0.10.0
libtpu: 0.0.40
codegen_flags: <defaults>
</compile_context>

<pallas_src>
import functools
import math

import jax
import jax.numpy as jnp
import numpy as np
from jax.experimental import pallas as pl
from jax.experimental.pallas import tpu as pltpu


def _round_up(x: int, m: int) -> int:
    return ((x + m - 1) // m) * m


def _cdiv(a: int, b: int) -> int:
    return (a + b - 1) // b


def _dsn_kernel(tok_ref, rhs_ref, cs_ref, out_ref, *,
                omega: int, use_phase: bool, dynamic_depth: bool):
    V = rhs_ref.shape[0]

    # Embedding gather (and, fused in the same matmul, the depth-gate pre-activation) as a
    # single one-hot (R, 256) x (256, rhs_w) MXU matmul.  f32 operands: one-hot rows are
    # exact, so the gather is bit-exact (no bf16 rounding of the tables).
    tok = tok_ref[...]                                           # (R, 1) int32
    ids = jax.lax.broadcasted_iota(jnp.int32, (1, V), 1)         # (1, V), loop-invariant
    onehot = (ids == tok).astype(jnp.float32)                    # (R, V) exact 0/1
    res = jnp.dot(onehot, rhs_ref[...], preferred_element_type=jnp.float32)

    if dynamic_depth:
        amp = res[:, :omega]
        z = res[:, omega:]            # = amp @ W^T + b  (bias folded into the table)
        amp = amp * jax.nn.sigmoid(z)
    else:
        amp = res

    if use_phase:
        cos = cs_ref[:, 0:1]                                     # (R, 1)
        sin = cs_ref[:, 1:2]
        # one full-width store: no masked 32-lane partial stores, no separate zero fill
        out_ref[...] = jnp.concatenate([amp * cos, amp * sin], axis=-1)
    else:
        out_ref[...] = amp


def dsn_embedding(tokens, table, w=None, b=None, *, use_phase=True, dynamic_depth=True,
                  max_seq_len=512, tile_rows=1024):
    """tokens: (B, L) int in [0,255]; table: (256, Ω); w: (Ω, Ω); b: (Ω,)."""
    B, L = tokens.shape
    V, omega = table.shape
    alpha = 2.0 * math.pi / max_seq_len
    out_dim = 2 * omega if use_phase else omega

    # ---- row tiling: big tiles (amortize per-step pipeline overhead); keep the grid even
    # and >= 2 steps on large problems (both v7x TensorCores busy); keep R_pad as close to
    # R as possible so the final row-slice is usually a no-op. ----
    R = B * L
    if R <= tile_rows:
        tile_r = max(8, _round_up(R, 8))
        n_steps = 1
    else:
        n_steps = _cdiv(R, tile_rows)
        if n_steps % 2:
            n_steps += 1                       # even step count -> both v7x cores get work
        tile_r = _round_up(_cdiv(R, n_steps), 8)
    R_pad = tile_r * n_steps

    tok_flat = tokens.astype(jnp.int32).reshape(R, 1)
    if R_pad > R:
        tok_flat = jnp.pad(tok_flat, ((0, R_pad - R), (0, 0)))

    # per-row phase tables: position inside the sequence is row % L; merged into one input
    pos = (jnp.arange(R_pad, dtype=jnp.int32) % L).astype(jnp.float32)
    cs = jnp.stack([jnp.cos(alpha * pos), jnp.sin(alpha * pos)], axis=-1)  # (R_pad, 2) f32

    # fused RHS: [table | table @ W^T + b]  (bias fold is exact: one-hot rows sum to 1)
    if dynamic_depth:
        gated = table @ w.T + b[None, :]
        rhs = jnp.concatenate([table, gated], axis=-1).astype(jnp.float32)  # (V, 2Ω)
    else:
        rhs = table.astype(jnp.float32)                                     # (V, Ω)
    rhs_w = rhs.shape[1]

    kernel = functools.partial(_dsn_kernel, omega=omega,
                               use_phase=use_phase, dynamic_depth=dynamic_depth)

    out_full = pl.pallas_call(
        kernel,
        out_shape=jax.ShapeDtypeStruct((R_pad, out_dim), jnp.float32),
        grid_spec=pltpu.PrefetchScalarGridSpec(
            num_scalar_prefetch=0,
            grid=(n_steps,),
            in_specs=[
                pl.BlockSpec((tile_r, 1), lambda i: (i, 0)),      # tokens (row tile)
                pl.BlockSpec((V, rhs_w), lambda i: (0, 0)),       # fused table (invariant)
                pl.BlockSpec((tile_r, 2), lambda i: (i, 0)),      # [cos, sin] per row
            ],
            out_specs=pl.BlockSpec((tile_r, out_dim), lambda i: (i, 0)),
        ),
        compiler_params=pltpu.CompilerParams(dimension_semantics=("parallel",)),
    )(tok_flat, rhs, cs)

    out = out_full if R_pad == R else out_full[:R]
    return out.reshape(B, L, out_dim)


def _reference(tokens, table, w, b, *, use_phase, dynamic_depth, max_seq_len):
    """Plain-JAX reference of the PyTorch forward."""
    B, L = tokens.shape
    alpha = 2.0 * math.pi / max_seq_len
    amp = table[tokens]
    if dynamic_depth:
        amp = amp * jax.nn.sigmoid(amp @ w.T + b)
    if not use_phase:
        return amp
    phi = (alpha * jnp.arange(L, dtype=jnp.float32)).reshape(1, L, 1)
    return jnp.concatenate([amp * jnp.cos(phi), amp * jnp.sin(phi)], axis=-1)


if __name__ == "__main__":
    OMEGA, V, MAX_SEQ = 32, 256, 512

    key = jax.random.PRNGKey(0)
    k1, k2, k3, k4, k5, k6 = jax.random.split(key, 6)

    # deterministic synthetic parameters (shapes follow the PyTorch module __init__)
    table = jax.random.normal(k2, (V, OMEGA), dtype=jnp.float32)             # nn.Embedding(256, Ω)
    bound = 1.0 / math.sqrt(OMEGA)
    w = jax.random.uniform(k3, (OMEGA, OMEGA), minval=-bound, maxval=bound,
                           dtype=jnp.float32)                                # nn.Linear(Ω, Ω).weight
    b = jax.random.uniform(k4, (OMEGA,), minval=-bound, maxval=bound,
                           dtype=jnp.float32)                                # nn.Linear(Ω, Ω).bias

    def check(tok, *, use_phase, dynamic_depth):
        out = jax.block_until_ready(
            dsn_embedding(tok, table, w, b, use_phase=use_phase,
                          dynamic_depth=dynamic_depth, max_seq_len=MAX_SEQ))
        ref = _reference(tok, table, w, b, use_phase=use_phase,
                         dynamic_depth=dynamic_depth, max_seq_len=MAX_SEQ)
        assert out.shape == ref.shape, (out.shape, ref.shape)
        np.testing.assert_allclose(np.asarray(out), np.asarray(ref), atol=1e-3, rtol=1e-3)

    # small case: single tile
    tok1 = jax.random.randint(k1, (2, 8), 0, 256, dtype=jnp.int32)
    check(tok1, use_phase=True, dynamic_depth=True)

    # medium case: single big tile, no row padding, row%L phase recovery
    tok2 = jax.random.randint(k5, (3, 160), 0, 256, dtype=jnp.int32)
    check(tok2, use_phase=True, dynamic_depth=True)

    # larger case: multi-step (even) grid path
    tok3 = jax.random.randint(k6, (4, 300), 0, 256, dtype=jnp.int32)
    check(tok3, use_phase=True, dynamic_depth=True)

    # feature-flag variants
    check(tok1, use_phase=False, dynamic_depth=True)   # no phase -> (B, L, Ω)
    check(tok2, use_phase=True, dynamic_depth=False)   # no gate  -> plain lookup + phase

    print("KERNEL_OK")
</pallas_src>

<mosaic_0001>
module attributes {stable_mosaic.version = 11 : i64} {
  func.func @_dsn_kernel(%arg0: i32, %arg1: memref<16x1xi32, #tpu.memory_space<vmem>>, %arg2: memref<256x64xf32, #tpu.memory_space<vmem>>, %arg3: memref<16x2xf32, #tpu.memory_space<vmem>>, %arg4: memref<16x64xf32, #tpu.memory_space<vmem>>) attributes {dimension_semantics = [#tpu.dimension_semantics<parallel>], iteration_bounds = array<i64: 1>, scalar_prefetch = 0 : i64, scratch_operands = 0 : i64, tpu.core_type = #tpu.core_type<tc>, window_params = [{transform_indices = @transform_0, window_bounds = array<i64: 16, 1>}, {pipeline_mode = #tpu.pipeline_mode<synchronous>, transform_indices = @transform_1, window_bounds = array<i64: 256, 64>}, {transform_indices = @transform_2, window_bounds = array<i64: 16, 2>}, {transform_indices = @transform_3, window_bounds = array<i64: 16, 64>}]} {
    %c0 = arith.constant 0 : index
    %c0_0 = arith.constant 0 : index
    %0 = vector.load %arg1[%c0, %c0_0] : memref<16x1xi32, #tpu.memory_space<vmem>>, vector<16x1xi32>
    %1 = tpu.iota {dimensions = array<i32: 1>} : vector<1x256xi32>
    %2 = vector.broadcast %1 : vector<1x256xi32> to vector<16x256xi32>
    %3 = vector.broadcast %0 : vector<16x1xi32> to vector<16x256xi32>
    %4 = arith.cmpi eq, %2, %3 : vector<16x256xi32>
    %5 = arith.extui %4 : vector<16x256xi1> to vector<16x256xi32>
    %6 = arith.sitofp %5 : vector<16x256xi32> to vector<16x256xf32>
    %c0_1 = arith.constant 0 : index
    %c0_2 = arith.constant 0 : index
    %7 = vector.load %arg2[%c0_1, %c0_2] : memref<256x64xf32, #tpu.memory_space<vmem>>, vector<256x64xf32>
    %cst = arith.constant dense<0.000000e+00> : vector<16x64xf32>
    %8 = tpu.matmul %6, %7, %cst {dimension_numbers = #tpu.dot_dimension_numbers<[1], [0], [0], [1], [0, 0, 1, 1], [], []>} : vector<16x256xf32>, vector<256x64xf32>, vector<16x64xf32> -> vector<16x64xf32>
    %9 = vector.extract_strided_slice %8 {offsets = [0, 0], sizes = [16, 32], strides = [1, 1]} : vector<16x64xf32> to vector<16x32xf32>
    %10 = vector.extract_strided_slice %8 {offsets = [0, 32], sizes = [16, 32], strides = [1, 1]} : vector<16x64xf32> to vector<16x32xf32>
    %11 = arith.negf %10 : vector<16x32xf32>
    %12 = math.exp %11 : vector<16x32xf32>
    %cst_3 = arith.constant 1.000000e+00 : f32
    %13 = vector.broadcast %cst_3 : f32 to vector<16x32xf32>
    %14 = arith.addf %13, %12 : vector<16x32xf32>
    %15 = arith.divf %13, %14 : vector<16x32xf32>
    %16 = arith.mulf %9, %15 : vector<16x32xf32>
    %c0_4 = arith.constant 0 : index
    %c0_5 = arith.constant 0 : index
    %17 = vector.load %arg3[%c0_4, %c0_5] : memref<16x2xf32, #tpu.memory_space<vmem>>, vector<16x1xf32>
    %c0_6 = arith.constant 0 : index
    %c1 = arith.constant 1 : index
    %18 = vector.load %arg3[%c0_6, %c1] : memref<16x2xf32, #tpu.memory_space<vmem>>, vector<16x1xf32>
    %19 = vector.broadcast %17 : vector<16x1xf32> to vector<16x32xf32>
    %20 = arith.mulf %16, %19 : vector<16x32xf32>
    %21 = vector.broadcast %18 : vector<16x1xf32> to vector<16x32xf32>
    %22 = arith.mulf %16, %21 : vector<16x32xf32>
    %23 = tpu.concatenate %20, %22 in 1 : vector<16x32xf32>, vector<16x32xf32> -> vector<16x64xf32>
    %c0_7 = arith.constant 0 : index
    %c0_8 = arith.constant 0 : index
    %24 = vector.load %arg4[%c0_7, %c0_8] : memref<16x64xf32, #tpu.memory_space<vmem>>, vector<16x64xf32>
    tpu.vector_store %arg4[%c0_7, %c0_8], %23 {strides = array<i32>} : memref<16x64xf32, #tpu.memory_space<vmem>>, vector<16x64xf32>,
    return
  }
  func.func @transform_0(%arg0: i32) -> (i32, i32) {
    %c0_i32 = arith.constant 0 : i32
    %c0_i32_0 = arith.constant 0 : i32
    return %arg0, %c0_i32 : i32, i32
  }
  func.func @transform_1(%arg0: i32) -> (i32, i32) {
    %c0_i32 = arith.constant 0 : i32
    %c0_i32_0 = arith.constant 0 : i32
    %c0_i32_1 = arith.constant 0 : i32
    return %c0_i32, %c0_i32_0 : i32, i32
  }
  func.func @transform_2(%arg0: i32) -> (i32, i32) {
    %c0_i32 = arith.constant 0 : i32
    %c0_i32_0 = arith.constant 0 : i32
    return %arg0, %c0_i32 : i32, i32
  }
  func.func @transform_3(%arg0: i32) -> (i32, i32) {
    %c0_i32 = arith.constant 0 : i32
    %c0_i32_0 = arith.constant 0 : i32
    return %arg0, %c0_i32 : i32, i32
  }
}

</mosaic_0001>

<bundles_post_ra>
// kernel: tpu_custom_call.1
= control target key start
LH: loop header
LB: loop body
LE: loop exit
PB: predicated region body
PF: predicated region fallthrough
CT: control target
= control target key end

     0   :  { %v361_v2 = vmov 0   ;;  %s511_s0 = inlined_call_operand.vmem [shape: s32[16,1], index: 0, kind: input, shape index: {}]   ;;  %s512_s1 = inlined_call_operand.vmem [shape: f32[256,64], index: 1, kind: input, shape index: {}]   ;;  %s513_s2 = inlined_call_operand.vmem [shape: f32[16,2], index: 2, kind: input, shape index: {}]   ;;  %s514_s3 = inlined_call_operand.hbm [shape: f32[16,64], index: 3, kind: output, shape index: {}]  }
   0x1   :  { %v15_v0 = vld [vmem:[%s511_s0] sm:$0xff]  ;;  %325 = vset.pattern.permute.xlu0 %v361_v2  ;;  %v16_v3 = vld [vmem:[%s511_s0 + $0x8] sm:$0xff]  ;;  %v56_v9 = vld [vmem:[%s512_s1 + $0x90] sm:$0xff] }
   0x2   :  { %v54_v1 = vld [vmem:[%s512_s1 + $0x80] sm:$0xff]  ;;  %v55_v4 = vld [vmem:[%s512_s1 + $0x88] sm:$0xff]  ;;  %21 = vperm.xlu0 %325, %v15_v0   ;;  %v57_v10 = vld [vmem:[%s512_s1 + $0x98] sm:$0xff] }
   0x3   :  { %v38_v5 = vld [vmem:[%s512_s1] sm:$0xff]  ;;  %v39_v6 = vld [vmem:[%s512_s1 + $0x8] sm:$0xff]  ;;  %v269_v7 = vpack.c.bf16 %v55_v4, %v54_v1  ;;  %v40_v11 = vld [vmem:[%s512_s1 + $0x10] sm:$0xff]  ;;  %v273_v12 = vpack.c.bf16 %v57_v10, %v56_v9 }
   0x4   :  { %v271_v8 = vpack.c.bf16 %v39_v6, %v38_v5  ;;  %v41_v13 = vld [vmem:[%s512_s1 + $0x18] sm:$0xff]  ;;  %v58_v14 = vld [vmem:[%s512_s1 + $0xa0] sm:$0xff]  ;;  %v59_v15 = vld [vmem:[%s512_s1 + $0xa8] sm:$0xff] }
   0x5   :  { %270 = vmatprep.subr.bf16.mxu0 %v269_v7  ;;  %301 = vmatprep.subr.bf16.mxu1 %v269_v7  ;;  %v275_v16 = vpack.c.bf16 %v41_v13, %v40_v11  ;;  %v277_v17 = vpack.c.bf16 %v59_v15, %v58_v14  ;;  %v42_v18 = vld [vmem:[%s512_s1 + $0x20] sm:$0xff]  ;;  %v43_v19 = vld [vmem:[%s512_s1 + $0x28] sm:$0xff]  ;;  %v60_v20 = vld [vmem:[%s512_s1 + $0xb0] sm:$0xff] }
   0x6   :  { %272 = vmatpush3.bf16.msra.mxu0 %v271_v8  ;;  %309 = vmatpush3.bf16.msra.mxu1 %v271_v8  ;;  %v61_v21 = vld [vmem:[%s512_s1 + $0xb8] sm:$0xff]  ;;  %v279_v22 = vpack.c.bf16 %v43_v19, %v42_v18  ;;  %v44_v24 = vld [vmem:[%s512_s1 + $0x30] sm:$0xff]  ;;  %v62_v26 = vld [vmem:[%s512_s1 + $0xc0] sm:$0xff] }
   0x7   :  { %24 = vperm.xlu0 %325, %v16_v3   ;;  %274 = vmatprep.subr.bf16.mxu0 %v273_v12  ;;  %v281_v23 = vpack.c.bf16 %v61_v21, %v60_v20  ;;  %v45_v25 = vld [vmem:[%s512_s1 + $0x38] sm:$0xff]  ;;  %v63_v27 = vld [vmem:[%s512_s1 + $0xc8] sm:$0xff] }
   0x8   :  { %302 = vmatprep.subr.bf16.mxu1 %v273_v12 }
   0xa   :  { %276 = vmatpush3.bf16.msra.mxu0 %v275_v16  ;;  %310 = vmatpush3.bf16.msra.mxu1 %v275_v16 }
   0xb   :  { %278 = vmatprep.subr.bf16.mxu0 %v277_v17  ;;  %303 = vmatprep.subr.bf16.mxu1 %v277_v17 }
   0xc   :  { %8 = vsyncpa [#allocation3], 0  ;;  %v283_v28 = vpack.c.bf16 %v45_v25, %v44_v24  ;;  %v285_v29 = vpack.c.bf16 %v63_v27, %v62_v26  ;;  %v46_v30 = vld [vmem:[%s512_s1 + $0x40] sm:$0xff]  ;;  %v47_v31 = vld [vmem:[%s512_s1 + $0x48] sm:$0xff]  ;;  %v17_v51 = vlaneseq  ;;  %v362_v55 = vmov 1.0   ;;  %s365_s26 = smov 32  }
   0xd   :  { %v64_v32 = vld [vmem:[%s512_s1 + $0xd0] sm:$0xff]  ;;  %v65_v33 = vld [vmem:[%s512_s1 + $0xd8] sm:$0xff]  ;;  %v287_v34 = vpack.c.bf16 %v47_v31, %v46_v30  ;;  %v66_v38 = vld [vmem:[%s512_s1 + $0xe0] sm:$0xff]  ;;  %v363_v57 = vmov 1   ;;  %vm199_vm4 = vcmask 261120   ;;  %vm202_vm5 = vcmask 523264  }
   0xe   :  { %280 = vmatpush3.bf16.msra.mxu0 %v279_v22  ;;  %311 = vmatpush3.bf16.msra.mxu1 %v279_v22  ;;  %v289_v35 = vpack.c.bf16 %v65_v33, %v64_v32  ;;  %v48_v36 = vld [vmem:[%s512_s1 + $0x50] sm:$0xff]  ;;  %v49_v37 = vld [vmem:[%s512_s1 + $0x58] sm:$0xff]  ;;  %v67_v39 = vld [vmem:[%s512_s1 + $0xe8] sm:$0xff]  ;;  %v18_v52 = vand.u32 127, %v17_v51  ;;  %s366_s27 = smov [#allocation2]  }
   0xf   :  { %282 = vmatprep.subr.bf16.mxu0 %v281_v23  ;;  %304 = vmatprep.subr.bf16.mxu1 %v281_v23  ;;  %v291_v40 = vpack.c.bf16 %v49_v37, %v48_v36  ;;  %v293_v41 = vpack.c.bf16 %v67_v39, %v66_v38  ;;  %v50_v42 = vld [vmem:[%s512_s1 + $0x60] sm:$0xff]  ;;  %v51_v43 = vld [vmem:[%s512_s1 + $0x68] sm:$0xff]  ;;  %v68_v44 = vld [vmem:[%s512_s1 + $0xf0] sm:$0xff]  ;;  %s210_s28 = sshll.u32 %s366_s27, 4  ;;  %s211_s28 = int_to_ptr.vmem [resolvable:$true] %s210_s28 }
  0x10   :  { %v69_v45 = vld [vmem:[%s512_s1 + $0xf8] sm:$0xff]  ;;  %v295_v46 = vpack.c.bf16 %v51_v43, %v50_v42  ;;  %v52_v48 = vld [vmem:[%s512_s1 + $0x70] sm:$0xff]  ;;  %v19_v53 = vadd.s32 128, %v18_v52  ;;  %326 = vset.pattern.permute.xlu1 %v363_v57  ;;  %v167_v58 = vld [vmem:[%s513_s2] sm:$0xff]  ;;  %s337_s29 = scalar_lea.vmem %s211_s28, 256  ;;  %p342_p1 = scmp.lt.s32.totalorder %s211_s28, %s211_s28 }
  0x11   :  { %v297_v47 = vpack.c.bf16 %v69_v45, %v68_v44  ;;  %v53_v49 = vld [vmem:[%s512_s1 + $0x78] sm:$0xff]  ;;  %182 = vperm.xlu1 %326, %v167_v58   ;;  %v168_v59 = vld [vmem:[%s513_s2 + $0x8] sm:$0xff]  ;;  %s364_s2 = smov 96   ;;  %p338_p0 = scmp.ne.s32.totalorder %s211_s28, %s337_s29 }
  0x12   :  { %284 = vmatpush3.bf16.msra.mxu0 %v283_v28  ;;  %312 = vmatpush3.bf16.msra.mxu1 %v283_v28  ;;  %v299_v50 = vpack.c.bf16 %v53_v49, %v52_v48  ;;  %p343_p2 = scmp.lt.s32.totalorder %s337_s29, %s337_s29 }
  0x13   :  { %286 = vmatprep.subr.bf16.mxu0 %v285_v29  ;;  %305 = vmatprep.subr.bf16.mxu1 %v285_v29 }
  0x14   :  { %p344_p3 = por %p343_p2, %p342_p1 }
  0x15   :  { %186 = vperm.xlu1 %326, %v168_v59  }
  0x16   :  { %288 = vmatpush3.bf16.msra.mxu0 %v287_v34  ;;  %313 = vmatpush3.bf16.msra.mxu1 %v287_v34  ;;  %p345_p4 = pnand %p344_p3, %p338_p0 }
  0x17   :  { %290 = vmatprep.subr.bf16.mxu0 %v289_v35  ;;  %306 = vmatprep.subr.bf16.mxu1 %v289_v35 }
  0x19   :  { %327 = vset.pattern.permute.xlu1 %v361_v2 }
  0x1a   :  { %292 = vmatpush3.bf16.msra.mxu0 %v291_v40  ;;  %314 = vmatpush3.bf16.msra.mxu1 %v291_v40 }
  0x1b   :  { %294 = vmatprep.subr.bf16.mxu0 %v293_v41  ;;  %307 = vmatprep.subr.bf16.mxu1 %v293_v41 }
  0x1e   :  { %296 = vmatpush3.bf16.msra.mxu0 %v295_v46  ;;  %315 = vmatpush3.bf16.msra.mxu1 %v295_v46 }
  0x1f   :  { %298 = vmatprep.subr.bf16.mxu0 %v297_v47  ;;  %308 = vmatprep.subr.bf16.mxu1 %v297_v47 }
  0x22   :  { %300 = vmatpush3.bf16.msra.mxu0 %v299_v50  ;;  %316 = vmatpush3.bf16.msra.mxu1 %v299_v50 }
  0x81   :  { %v22_v54 = vpop.permute.xlu0 %21 }
  0x82   :  { %vm26_vm0 = vcmp.eq.s32.totalorder %v18_v52, %v22_v54  ;;  %vm27_vm1 = vcmp.eq.s32.totalorder %v19_v53, %v22_v54 }
  0x83   :  { %225 = vmatprep.mubr.msk.f32.mxu0 %vm27_vm1, %v362_v55 }
  0x84   :  { %226 = vmatmul.mubr.msk.f32.vlgmr.msra.gmra.mrb[0].mxu0 %vm26_vm0, %v362_v55 }
  0x86   :  { %v25_v56 = vpop.permute.xlu0 %24 }
  0x87   :  { %vm28_vm2 = vcmp.eq.s32.totalorder %v18_v52, %v25_v56  ;;  %vm29_vm3 = vcmp.eq.s32.totalorder %v19_v53, %v25_v56 }
  0x88   :  { %227 = vmatprep.mubr.msk.f32.mxu1 %vm29_vm3, %v362_v55 }
  0x89   :  { %228 = vmatmul.mubr.msk.f32.vlgmr.msra.gmra.mrb[0].mxu1 %vm28_vm2, %v362_v55 }
  0x90   :  { %v183_v10 = vpop.permute.xlu1 %182 }
  0x94   :  { %v187_v11 = vpop.permute.xlu1 %186 }
 0x157   :  { %v263_v60 = vpop.f32.mrb[0].mxu0 }
 0x158   :  { %v264_v61 = vpop.f32.mrb[1].mxu0 }
 0x159   :  { %v265_v62 = vadd.f32 %v264_v61, %v263_v60 }
 0x15b   :  { %v229_v63 = vmul.f32 -1.442695, %v265_v62 }
 0x15c   :  { %v266_v0 = vpop.f32.mrb[0].mxu1 }
 0x15d   :  { %v267_v1 = vpop.f32.mrb[1].mxu1  ;;  %329 = vpow2.f32 %v229_v63 }
 0x15e   :  { %v268_v3 = vadd.f32 %v267_v1, %v266_v0 }
 0x160   :  { %v230_v4 = vmul.f32 -1.442695, %v268_v3 }
 0x162   :  { %331 = vpow2.f32 %v230_v4 }
 0x167   :  { %v330_v5 = vpop.eup %329 }
 0x168   :  { %v151_v6 = vadd.f32 1.0, %v330_v5 }
 0x16a   :  { %333 = vrcp.f32 %v151_v6 }
 0x16c   :  { %v332_v7 = vpop.eup %331 }
 0x16d   :  { %v152_v8 = vadd.f32 1.0, %v332_v7 }
 0x16f   :  { %335 = vrcp.f32 %v152_v8 }
 0x174   :  { %v334_v9 = vpop.eup %333 }
 0x175   :  { %159 = vrot.lane.b32.xlu0 %v334_v9, %s364_s2 }
 0x179   :  { %v336_v2 = vpop.eup %335  ;;  %171 = vperm.xlu0 %325, %v167_v58  }
 0x17a   :  { %161 = vrot.lane.b32.xlu1 %v336_v2, %s364_s2 }
 0x17d   :  { %328 = vset.pattern.permute.xlu0 %v363_v57 }
 0x17e   :  { %176 = vperm.xlu1 %327, %v168_v59  }
 0x1e7   :  { %v160_v12 = vpop.permute.xlu0 %159 }
 0x1e8   :  { %v165_v13 = vmul.f32 %v265_v62, %v160_v12 }
 0x1ea   :  { %v189_v14 = vmul.f32 %v183_v10, %v165_v13 }
 0x1ec   :  { %v162_v15 = vpop.permute.xlu1 %161  ;;  %193 = vrot.lane.b32.xlu0 %v189_v14, %s365_s26 }
 0x1ed   :  { %v166_v16 = vmul.f32 %v268_v3, %v162_v15 }
 0x1ef   :  { %v190_v17 = vmul.f32 %v187_v11, %v166_v16 }
 0x1f1   :  { %195 = vrot.lane.b32.xlu1 %v190_v17, %s365_s26 }
 0x1f8   :  { %v172_v18 = vpop.permute.xlu0 %171 }
 0x1f9   :  { %v179_v19 = vmul.f32 %v172_v18, %v165_v13 }
 0x1fd   :  { %v177_v20 = vpop.permute.xlu1 %176 }
 0x1fe   :  { %v180_v23 = vmul.f32 %v177_v20, %v166_v16 }
 0x25e   :  { %v194_v21 = vpop.permute.xlu0 %193 }
 0x25f   :  { %v200_v22 = vsel %vm199_vm4, %v179_v19, %v194_v21 }
 0x260   :  { %203 = vst.msk [vmem:[#allocation2] sm:$0xff] %vm202_vm5, %v200_v22 }
 0x263   :  { %v196_v24 = vpop.permute.xlu1 %195 }
 0x264   :  { %v201_v25 = vsel %vm199_vm4, %v180_v23, %v196_v24 }
 0x265   :  { %204 = vst.msk [vmem:[#allocation2 + $0x8] sm:$0xff] %vm202_vm5, %v201_v25 }
 0x266   :  { %348 = shalt.err (!%p345_p4)
}
 0x267   :  { %s349_s5 = scalar_lea.hbm %s514_s3, 256 }
 0x268   :  { %p350_p5 = scmp.ne.s32.totalorder %s514_s3, %s349_s5  ;;  %p353_p6 = scmp.lt.u32.totalorder %s349_s5, %s514_s3 }
 0x26a   :  { %p355_p7 = pnand %p353_p6, %p350_p5 }
 0x26c   :  { %358 = shalt.err (!%p355_p7)
}
 0x26d   :  { %s367_s10 = smov 128   ;;  %s368_s11 = smov 8  }
 0x26e   :  { %216 = dma.vmem_to_hbm [thread:$0]  %s211_s28, 256, %s514_s3, [#allocation3], %s367_s10, %s367_s10, %s368_s11  }
 0x26f   :  { %359 = dma.done.wait [#allocation3], 256  }
 0x270   :  { %360 = vsyncadd [#allocation3], 4294967040 }
 0x271   :  { %220 = vsyncpa [#allocation3], 1 }

</bundles_post_ra>
